<compile_context>
chip_gen: v6e
topology: v6e:2x2x1
jax: 0.10.0
libtpu: 0.0.40
codegen_flags: <defaults>
</compile_context>

<pallas_src>
import jax
import jax.numpy as jnp
from jax import lax
from jax.experimental import pallas as pl
from jax.experimental.pallas import tpu as pltpu

_LANES = 128
_INT32_MAX = jnp.iinfo(jnp.int32).max


def _round_down(x, m):
    return (x // m) * m


def _pick_fold(batch, vocab, itemsize):
    """Largest F with F | vocab, vocab//F >= 128 and batch*F <= sublane target."""
    target_rows = {4: 8, 2: 16, 1: 32}.get(itemsize, 8)
    if batch >= target_rows:
        return 1
    for f in range(target_rows // batch, 0, -1):
        if vocab % f == 0 and vocab // f >= _LANES:
            return f
    return 1


def _make_kernel(*, rows, tile, vf, state_lanes, n_tiles, need_mask,
                 tail_chunks, x_dtype):
    n_chunks = tile // state_lanes

    def kernel(x_ref, max_ref, idx_ref, rmax_ref, ridx_ref):
        j = pl.program_id(0)

        @pl.when(j == 0)
        def _init():
            rmax_ref[...] = jnp.full_like(rmax_ref, -jnp.inf)
            ridx_ref[...] = jnp.zeros_like(ridx_ref)

        lane = lax.broadcasted_iota(jnp.int32, (rows, state_lanes), 1)
        base_col = j * tile  # first (folded-row-local) column of this tile

        def merge(n_iter, masked):
            # Hoisted out of the chunk loop (JAX does not CSE broadcasts).
            neg_inf = (jnp.full((rows, state_lanes), -jnp.inf, dtype=x_dtype)
                       if masked else None)

            def body(k, carry):
                rmax, ridx = carry
                start = pl.multiple_of(k * state_lanes, state_lanes)
                xk = x_ref[:, pl.ds(start, state_lanes)]   # native dtype, no f32 copy
                chunk_base = base_col + k * state_lanes    # scalar int32
                if masked:
                    col = chunk_base + lane
                    xk = jnp.where(col < vf, xk, neg_inf)
                better = xk > rmax                         # strict '>' -> first occurrence
                ridx = jnp.where(better, chunk_base, ridx)  # splat only; +lane at finalize
                rmax = jnp.where(better, xk, rmax)
                return rmax, ridx

            rmax, ridx = lax.fori_loop(0, n_iter, body,
                                       (rmax_ref[...], ridx_ref[...]),
                                       unroll=min(8, n_iter))
            rmax_ref[...] = rmax
            ridx_ref[...] = ridx

        if not need_mask:
            merge(n_chunks, False)
        elif n_tiles == 1:
            merge(tail_chunks, True)
        else:
            @pl.when(j < n_tiles - 1)
            def _interior():
                merge(n_chunks, False)

            @pl.when(j == n_tiles - 1)
            def _tail():
                merge(tail_chunks, True)

        @pl.when(j == n_tiles - 1)
        def _finalize():
            rm = rmax_ref[...]
            row_max = jnp.max(rm, axis=1, keepdims=True)                # XLU, once
            cand = jnp.where(rm == row_max, ridx_ref[...] + lane, _INT32_MAX)
            idx_ref[...] = jnp.min(cand, axis=1, keepdims=True)         # first occurrence
            max_ref[...] = row_max.astype(max_ref.dtype)

    return kernel


def greedy_head(m_logits):
    """Greedy next-token indices for [batch, vocab] logits -> [batch, 1] int32."""
    B, V = m_logits.shape
    if not jnp.issubdtype(m_logits.dtype, jnp.floating):
        m_logits = m_logits.astype(jnp.float32)          # matches torch's .float()
    dtype = m_logits.dtype
    itemsize = jnp.dtype(dtype).itemsize

    # --- sublane folding for small batch (free row-major reshape) -----------
    F = _pick_fold(B, V, itemsize)
    rows, vf = B * F, V // F
    x = m_logits.reshape(rows, vf) if F > 1 else m_logits

    # --- tile sizing: as large as the generation's VMEM budget allows -------
    if vf >= _LANES:
        state_lanes = _LANES
        max_tile = _round_down(vf, _LANES)   # first blocks always in-bounds
    else:
        state_lanes = vf
        max_tile = vf
    try:
        vmem_cap = int(pltpu.get_tpu_info().vmem_capacity_bytes)
    except Exception:
        vmem_cap = 64 << 20                  # v7x per-TC capacity (smallest)
    if vmem_cap < (32 << 20):
        vmem_cap = 64 << 20
    input_budget = min(vmem_cap // 2, 64 << 20)   # 2 pipeline buffers of the input
    tile = max_tile
    while 2 * rows * tile * itemsize > input_budget and tile > state_lanes:
        tile = max(state_lanes, _round_down(tile // 2, state_lanes))

    n_tiles = pl.cdiv(vf, tile)
    need_mask = (n_tiles * tile) != vf
    tail_valid = vf - (n_tiles - 1) * tile
    tail_chunks = pl.cdiv(tail_valid, state_lanes)

    scratch_bytes = rows * state_lanes * (itemsize + 4)
    needed = 2 * rows * tile * itemsize + scratch_bytes + rows * 32 + (1 << 20)
    vmem_limit = int(min(vmem_cap - (8 << 20), max(needed + (4 << 20), 32 << 20)))

    kernel = _make_kernel(rows=rows, tile=tile, vf=vf, state_lanes=state_lanes,
                          n_tiles=n_tiles, need_mask=need_mask,
                          tail_chunks=tail_chunks, x_dtype=dtype)

    pmax, pidx = pl.pallas_call(
        kernel,
        out_shape=(jax.ShapeDtypeStruct((rows, 1), jnp.float32),   # per-row max
                   jax.ShapeDtypeStruct((rows, 1), jnp.int32)),    # per-row argmax
        grid_spec=pltpu.PrefetchScalarGridSpec(
            num_scalar_prefetch=0,
            grid=(n_tiles,),
            in_specs=[pl.BlockSpec((rows, tile), lambda j: (0, j))],
            out_specs=[pl.BlockSpec((rows, 1), lambda j: (0, 0)),
                       pl.BlockSpec((rows, 1), lambda j: (0, 0))],
            scratch_shapes=[pltpu.VMEM((rows, state_lanes), dtype),      # running max
                            pltpu.VMEM((rows, state_lanes), jnp.int32)],  # running base
        ),
        compiler_params=pltpu.CompilerParams(
            dimension_semantics=("arbitrary",),
            vmem_limit_bytes=vmem_limit),
        cost_estimate=pl.CostEstimate(flops=B * V, transcendentals=0,
                                      bytes_accessed=B * V * itemsize + rows * 8),
    )(x)

    if F == 1:
        return pidx

    # Fold the F sub-rows back to one token per batch row (first occurrence wins;
    # the bf16/f16 -> f32 cast of the per-row max is exact, so ties are exact).
    pm = pmax.reshape(B, F)
    gi = pidx.reshape(B, F) + (jnp.arange(F, dtype=jnp.int32) * vf)[None, :]
    best = jnp.max(pm, axis=1, keepdims=True)
    return jnp.min(jnp.where(pm == best, gi, _INT32_MAX), axis=1, keepdims=True)


if __name__ == "__main__":
    key = jax.random.PRNGKey(0)
    k1, k2, k3 = jax.random.split(key, 3)

    def ref_greedy(x):
        return jnp.argmax(x.astype(jnp.float32), axis=-1, keepdims=True).astype(jnp.int32)

    # Case 1: small decode head, bf16 (sublane folding, single tile, no mask).
    B, V = 2, 512
    logits = jax.random.normal(k1, (B, V), dtype=jnp.bfloat16)
    tok = jax.block_until_ready(greedy_head(logits))
    assert tok.shape == (B, 1) and tok.dtype == jnp.int32, (tok.shape, tok.dtype)
    assert jnp.array_equal(tok, ref_greedy(logits)), (tok, ref_greedy(logits))

    # Case 2: folded vocab not a multiple of 128 (multi-tile grid, masked tail
    # tile, cross-sub-row fold in the wrapper).
    B2, V2 = 2, 2176
    logits2 = jax.random.normal(k2, (B2, V2), dtype=jnp.bfloat16)
    tok2 = jax.block_until_ready(greedy_head(logits2))
    assert tok2.shape == (B2, 1) and jnp.array_equal(tok2, ref_greedy(logits2))

    # Case 3: f32, odd batch / vocab (partial sublane rows + masked tail tile).
    B3, V3 = 3, 1000
    logits3 = jax.random.normal(k3, (B3, V3), dtype=jnp.float32)
    tok3 = jax.block_until_ready(greedy_head(logits3))
    assert tok3.shape == (B3, 1) and jnp.array_equal(tok3, ref_greedy(logits3))

    print("KERNEL_OK")
</pallas_src>

<mosaic_0001>
module attributes {stable_mosaic.version = 11 : i64} {
  func.func @kernel(%arg0: i32, %arg1: memref<8x128xbf16, #tpu.memory_space<vmem>>, %arg2: memref<8x1xf32, #tpu.memory_space<vmem>>, %arg3: memref<8x1xi32, #tpu.memory_space<vmem>>, %arg4: memref<8x128xbf16, #tpu.memory_space<vmem>>, %arg5: memref<8x128xi32, #tpu.memory_space<vmem>>) attributes {dimension_semantics = [#tpu.dimension_semantics<arbitrary>], iteration_bounds = array<i64: 1>, scalar_prefetch = 0 : i64, scratch_operands = 2 : i64, tpu.core_type = #tpu.core_type<tc>, window_params = [{transform_indices = @transform_0, window_bounds = array<i64: 8, 128>}, {pipeline_mode = #tpu.pipeline_mode<synchronous>, transform_indices = @transform_1, window_bounds = array<i64: 8, 1>}, {pipeline_mode = #tpu.pipeline_mode<synchronous>, transform_indices = @transform_2, window_bounds = array<i64: 8, 1>}]} {
    %c0_i32 = arith.constant 0 : i32
    %0 = arith.cmpi eq, %arg0, %c0_i32 : i32
    %1 = arith.extui %0 : i1 to i32
    %c0_i32_0 = arith.constant 0 : i32
    %2 = arith.cmpi ne, %1, %c0_i32_0 : i32
    scf.if %2 {
      %cst = arith.constant 0xFF80 : bf16
      %22 = vector.broadcast %cst : bf16 to vector<8x128xbf16>
      %c0_14 = arith.constant 0 : index
      %c0_15 = arith.constant 0 : index
      %23 = vector.load %arg4[%c0_14, %c0_15] : memref<8x128xbf16, #tpu.memory_space<vmem>>, vector<8x128xbf16>
      tpu.vector_store %arg4[%c0_14, %c0_15], %22 {strides = array<i32>} : memref<8x128xbf16, #tpu.memory_space<vmem>>, vector<8x128xbf16>,
      %c0_i32_16 = arith.constant 0 : i32
      %24 = vector.broadcast %c0_i32_16 : i32 to vector<8x128xi32>
      %c0_17 = arith.constant 0 : index
      %c0_18 = arith.constant 0 : index
      %25 = vector.load %arg5[%c0_17, %c0_18] : memref<8x128xi32, #tpu.memory_space<vmem>>, vector<8x128xi32>
      tpu.vector_store %arg5[%c0_17, %c0_18], %24 {strides = array<i32>} : memref<8x128xi32, #tpu.memory_space<vmem>>, vector<8x128xi32>,
    } else {
    }
    %3 = tpu.iota {dimensions = array<i32: 1>} : vector<8x128xi32>
    %c128_i32 = arith.constant 128 : i32
    %4 = arith.muli %arg0, %c128_i32 : i32
    %c0 = arith.constant 0 : index
    %c0_1 = arith.constant 0 : index
    %5 = vector.load %arg4[%c0, %c0_1] : memref<8x128xbf16, #tpu.memory_space<vmem>>, vector<8x128xbf16>
    %c0_2 = arith.constant 0 : index
    %c0_3 = arith.constant 0 : index
    %6 = vector.load %arg5[%c0_2, %c0_3] : memref<8x128xi32, #tpu.memory_space<vmem>>, vector<8x128xi32>
    %c0_i32_4 = arith.constant 0 : i32
    %c128_i32_5 = arith.constant 128 : i32
    %7 = arith.muli %c0_i32_4, %c128_i32_5 : i32
    %8 = tpu.assume_multiple %7, 128 : i32
    %c0_6 = arith.constant 0 : index
    %9 = arith.index_cast %8 : i32 to index
    %10 = vector.load %arg1[%c0_6, %9] : memref<8x128xbf16, #tpu.memory_space<vmem>>, vector<8x128xbf16>
    %c128_i32_7 = arith.constant 128 : i32
    %11 = arith.muli %c0_i32_4, %c128_i32_7 : i32
    %12 = arith.addi %4, %11 : i32
    %13 = arith.cmpf ogt, %10, %5 : vector<8x128xbf16>
    %14 = vector.broadcast %12 : i32 to vector<8x128xi32>
    %15 = arith.select %13, %14, %6 : vector<8x128xi1>, vector<8x128xi32>
    %16 = arith.select %13, %10, %5 : vector<8x128xi1>, vector<8x128xbf16>
    %c1_i32 = arith.constant 1 : i32
    %c0_8 = arith.constant 0 : index
    %c0_9 = arith.constant 0 : index
    %17 = vector.load %arg4[%c0_8, %c0_9] : memref<8x128xbf16, #tpu.memory_space<vmem>>, vector<8x128xbf16>
    tpu.vector_store %arg4[%c0_8, %c0_9], %16 {strides = array<i32>} : memref<8x128xbf16, #tpu.memory_space<vmem>>, vector<8x128xbf16>,
    %c0_10 = arith.constant 0 : index
    %c0_11 = arith.constant 0 : index
    %18 = vector.load %arg5[%c0_10, %c0_11] : memref<8x128xi32, #tpu.memory_space<vmem>>, vector<8x128xi32>
    tpu.vector_store %arg5[%c0_10, %c0_11], %15 {strides = array<i32>} : memref<8x128xi32, #tpu.memory_space<vmem>>, vector<8x128xi32>,
    %c0_i32_12 = arith.constant 0 : i32
    %19 = arith.cmpi eq, %arg0, %c0_i32_12 : i32
    %20 = arith.extui %19 : i1 to i32
    %c0_i32_13 = arith.constant 0 : i32
    %21 = arith.cmpi ne, %20, %c0_i32_13 : i32
    scf.if %21 {
      %c0_14 = arith.constant 0 : index
      %c0_15 = arith.constant 0 : index
      %22 = vector.load %arg4[%c0_14, %c0_15] : memref<8x128xbf16, #tpu.memory_space<vmem>>, vector<8x128xbf16>
      %cst = arith.constant dense<0xFF80> : vector<8xbf16>
      %23 = vector.multi_reduction <maximumf>, %22, %cst [1] : vector<8x128xbf16> to vector<8xbf16>
      %24 = vector.shape_cast %23 : vector<8xbf16> to vector<8x1xbf16>
      %25 = vector.broadcast %24 : vector<8x1xbf16> to vector<8x128xbf16>
      %26 = arith.cmpf oeq, %22, %25 : vector<8x128xbf16>
      %c0_16 = arith.constant 0 : index
      %c0_17 = arith.constant 0 : index
      %27 = vector.load %arg5[%c0_16, %c0_17] : memref<8x128xi32, #tpu.memory_space<vmem>>, vector<8x128xi32>
      %28 = arith.addi %27, %3 : vector<8x128xi32>
      %c2147483647_i32 = arith.constant 2147483647 : i32
      %29 = vector.broadcast %c2147483647_i32 : i32 to vector<8x128xi32>
      %30 = arith.select %26, %28, %29 : vector<8x128xi1>, vector<8x128xi32>
      %cst_18 = arith.constant dense<2147483647> : vector<8xi32>
      %31 = vector.multi_reduction <minsi>, %30, %cst_18 [1] : vector<8x128xi32> to vector<8xi32>
      %32 = vector.shape_cast %31 : vector<8xi32> to vector<8x1xi32>
      %c0_19 = arith.constant 0 : index
      %c0_20 = arith.constant 0 : index
      %33 = vector.load %arg3[%c0_19, %c0_20] : memref<8x1xi32, #tpu.memory_space<vmem>>, vector<8x1xi32>
      tpu.vector_store %arg3[%c0_19, %c0_20], %32 {strides = array<i32>} : memref<8x1xi32, #tpu.memory_space<vmem>>, vector<8x1xi32>,
      %34 = arith.extf %24 : vector<8x1xbf16> to vector<8x1xf32>
      %c0_21 = arith.constant 0 : index
      %c0_22 = arith.constant 0 : index
      %35 = vector.load %arg2[%c0_21, %c0_22] : memref<8x1xf32, #tpu.memory_space<vmem>>, vector<8x1xf32>
      tpu.vector_store %arg2[%c0_21, %c0_22], %34 {strides = array<i32>} : memref<8x1xf32, #tpu.memory_space<vmem>>, vector<8x1xf32>,
    } else {
    }
    return
  }
  func.func @transform_0(%arg0: i32) -> (i32, i32) {
    %c0_i32 = arith.constant 0 : i32
    %c0_i32_0 = arith.constant 0 : i32
    return %c0_i32, %arg0 : i32, i32
  }
  func.func @transform_1(%arg0: i32) -> (i32, i32) {
    %c0_i32 = arith.constant 0 : i32
    %c0_i32_0 = arith.constant 0 : i32
    %c0_i32_1 = arith.constant 0 : i32
    return %c0_i32, %c0_i32_0 : i32, i32
  }
  func.func @transform_2(%arg0: i32) -> (i32, i32) {
    %c0_i32 = arith.constant 0 : i32
    %c0_i32_0 = arith.constant 0 : i32
    %c0_i32_1 = arith.constant 0 : i32
    return %c0_i32, %c0_i32_0 : i32, i32
  }
}

</mosaic_0001>

<bundles_post_ra>
// kernel: tpu_custom_call.1
= control target key start
LH: loop header
LB: loop body
LE: loop exit
PB: predicated region body
PF: predicated region fallthrough
CT: control target
= control target key end

     0   :  { %8 = vsyncpa [#allocation5], 0  ;;  %s116_s9 = smov [#allocation4]   ;;  %s145_s0 = inlined_call_operand.hbm [shape: bf16[8,128], index: 0, kind: input, shape index: {}]   ;;  %s146_s1 = inlined_call_operand.vmem [shape: f32[8,1], index: 1, kind: output, shape index: {0}]   ;;  %s147_s2 = inlined_call_operand.vmem [shape: s32[8,1], index: 2, kind: output, shape index: {1}]  }
   0x1   :  { %s15_s10 = sshll.u32 %s116_s9, 4  ;;  %s16_s10 = int_to_ptr.vmem [resolvable:$true] %s15_s10 }
   0x2   :  { %s102_s11 = scalar_lea.vmem %s16_s10, 64  ;;  %p107_p1 = scmp.lt.s32.totalorder %s16_s10, %s16_s10 }
   0x3   :  { %p103_p0 = scmp.ne.s32.totalorder %s16_s10, %s102_s11  ;;  %p108_p2 = scmp.lt.s32.totalorder %s102_s11, %s102_s11 }
   0x5   :  { %p109_p3 = por %p108_p2, %p107_p1 }
   0x7   :  { %p110_p4 = pnand %p109_p3, %p103_p0 }
   0x9   :  { %113 = shalt.err (!%p110_p4)
}
   0xa   :  { %18 = dma.hbm_to_vmem [thread:$0]  %s145_s0, 64, %s16_s10, [#allocation5]  }
   0xb   :  { %114 = dma.done.wait [#allocation5], 64  }
   0xc   :  { %115 = vsyncadd [#allocation5], 4294967232  ;;  %v117_v0 = vmov 4286644096   ;;  %v36_v1 = vld [vmem:[#allocation4] sm:$0xf]  ;;  %v31_v6 = vlaneseq }
   0xd   :  { %29 = vst [vmem:[#allocation2] sm:$0xf] %v117_v0  ;;  %vm50_vm1 = vcmask 1043456   ;;  %vm78_vm2 = vcmask 7168   ;;  %v118_v9 = vmov 0  }
   0xe   :  { %v32_v11 = vand.u32 127, %v31_v6 }
  0x14   :  { %v34_v2 = vld [vmem:[#allocation2] sm:$0xf] }
  0x15   :  { %vm37_vm0 = vcmp.gt.bf16.partialorder %v36_v1, %v34_v2 }
  0x16   :  { %v43_v3 = vsel %vm37_vm0, %v36_v1, %v34_v2 }
  0x17   :  { %44 = vst [vmem:[#allocation2] sm:$0xf] %v43_v3 }
  0x1e   :  { %v49_v4 = vld [vmem:[#allocation2] sm:$0xf] }
  0x1f   :  { %v53_v5 = vsel %vm50_vm1, %v49_v4, 4286644096 }
  0x20   :  { %55 = vmax.xlane.bf16.xlu0 %v53_v5 }
  0xad   :  { %v56_v7 = vpop.xlane.xlu0 %55 }
  0xae   :  { %vm57_vm3 = vcmp.eq.bf16.partialorder %v49_v4, %v56_v7  ;;  %v80_v8 = vunpack.c.l.bf16 %v56_v7 }
  0xaf   :  { %v60_v10 = vsel %vm57_vm3, 65537, %v118_v9 }
  0xb0   :  { %v61_v12 = vunpack.c.l.b16 %v60_v10  ;;  %81 = vst.msk [vmem:[%s146_s1] sm:$0xff] %vm78_vm2, %v80_v8 }
  0xb2   :  { %vm62_vm4 = vcmp.ne.s32.totalorder %v61_v12, 0 }
  0xb3   :  { %v63_v13 = vsel %vm62_vm4, %v32_v11, 2147483647 }
  0xb4   :  { %v65_v14 = vshra.s32 %v63_v13, 16  ;;  %v64_v16 = vand.u32 65535, %v63_v13 }
  0xb6   :  { %v67_v15 = vcvt.s32.f32 %v65_v14  ;;  %v66_v18 = vcvt.s32.f32 %v64_v16 }
  0xb8   :  { %68 = vmin.xlane.f32.xlu0 %v67_v15 }
 0x141   :  { %v69_v17 = vpop.xlane.xlu0 %68 }
 0x142   :  { %vm70_vm5 = vcmp.eq.f32.partialorder %v67_v15, %v69_v17  ;;  %v75_v20 = vcvt.f32.s32 %v69_v17 }
 0x143   :  { %v71_v19 = vsel %vm70_vm5, %v66_v18, inf }
 0x144   :  { %72 = vmin.xlane.f32.xlu1 %v71_v19  ;;  %v76_v22 = vshll.u32 %v75_v20, 16 }
 0x1cd   :  { %v73_v21 = vpop.xlane.xlu1 %72 }
 0x1ce   :  { %v74_v23 = vcvt.f32.s32 %v73_v21 }
 0x1d0   :  { %v77_v24 = vadd.s32 %v76_v22, %v74_v23 }
 0x1d2   :  { %79 = vst.msk [vmem:[%s147_s2] sm:$0xff] %vm78_vm2, %v77_v24 }
 0x1d3   :  { %90 = vsyncpa [#allocation5], 1 }

</bundles_post_ra>
